<compile_context>
chip_gen: v7x
topology: tpu7x:2x2x1
jax: 0.10.0
libtpu: 0.0.40
codegen_flags: <defaults>
</compile_context>

<pallas_src>
import jax
import jax.numpy as jnp
from jax.experimental import pallas as pl
from jax.experimental.pallas import tpu as pltpu


_LAYER_SIZES = [128, 64, 16, 4, 1]


def _mlp_kernel(x_ref,
                w1_ref, b1_ref,
                w2_ref, b2_ref,
                w3_ref, b3_ref,
                w4_ref, b4_ref,
                w5_ref, b5_ref,
                o_ref):
    # x_ref: (n_features, TB) bf16 — batch on the lane axis.
    h = x_ref[...]

    def _hidden(h_bf16, w_ref, b_ref):
        z = jnp.dot(w_ref[...], h_bf16,
                    preferred_element_type=jnp.float32) + b_ref[...]
        return jnp.maximum(z, 0.0).astype(jnp.bfloat16)

    h = _hidden(h, w1_ref, b1_ref)      # (128, TB)
    h = _hidden(h, w2_ref, b2_ref)      # (64,  TB)
    h = _hidden(h, w3_ref, b3_ref)      # (16,  TB)
    h = _hidden(h, w4_ref, b4_ref)      # (4,   TB)

    z = jnp.dot(w5_ref[...], h,
                preferred_element_type=jnp.float32) + b5_ref[...]   # (1, TB)
    # sigmoid = 1 / (1 + exp(-z)); exp and approx-reciprocal both run on EUP.
    o_ref[...] = pl.reciprocal(1.0 + jnp.exp(-z), approx=True)


def net_forward(x, params, *, tb=1024):
    """Forward pass of Net.

    x:      (B, n_features) float32
    params: list of (W, b) with W: (out_features, in_features), b: (out_features, 1)
    returns (B, 1) float32
    """
    B, n_features = x.shape

    # Lane-dense batch tiling.  Block last-dim must be a multiple of 128 or
    # equal the full array dim, so small B uses a single full-size tile and
    # large B is padded up to a multiple of the tile.
    if B <= tb:
        TB = B
        B_pad = B
    else:
        TB = tb
        B_pad = ((B + TB - 1) // TB) * TB

    xt = x.T.astype(jnp.bfloat16)                         # (n_features, B)
    if B_pad != B:
        xt = jnp.pad(xt, ((0, 0), (0, B_pad - B)))

    flat_args = [xt]
    in_specs = [pl.BlockSpec((n_features, TB), lambda i: (0, i))]
    for (w, b) in params:
        flat_args.append(w.astype(jnp.bfloat16))
        flat_args.append(b.astype(jnp.float32))
        # Full-array blocks, fetched once and held resident across batch tiles.
        in_specs.append(pl.BlockSpec(w.shape, lambda i: (0, 0)))
        in_specs.append(pl.BlockSpec(b.shape, lambda i: (0, 0)))

    grid = (B_pad // TB,)
    out_spec = pl.BlockSpec((1, TB), lambda i: (0, i))

    flops = 2 * B_pad * sum(
        f_in * f_out
        for f_in, f_out in zip([n_features] + _LAYER_SIZES[:-1], _LAYER_SIZES))
    bytes_accessed = (xt.size * 2
                      + sum(w.size * 2 + b.size * 4 for w, b in params)
                      + B_pad * 4)

    out_t = pl.pallas_call(
        _mlp_kernel,
        out_shape=jax.ShapeDtypeStruct((1, B_pad), jnp.float32),
        grid=grid,
        in_specs=in_specs,
        out_specs=out_spec,
        compiler_params=pltpu.CompilerParams(
            dimension_semantics=("parallel",)),
        cost_estimate=pl.CostEstimate(
            flops=flops, transcendentals=B_pad, bytes_accessed=bytes_accessed),
    )(*flat_args)

    return out_t[:, :B].T                                 # (B, 1)


def init_params(key, n_features):
    """Deterministic init mimicking nn.Linear's uniform(-1/sqrt(fan_in), +)."""
    dims = [n_features] + _LAYER_SIZES
    params = []
    for fan_in, fan_out in zip(dims[:-1], dims[1:]):
        key, kw, kb = jax.random.split(key, 3)
        bound = 1.0 / jnp.sqrt(jnp.float32(fan_in))
        w = jax.random.uniform(kw, (fan_out, fan_in), jnp.float32, -bound, bound)
        b = jax.random.uniform(kb, (fan_out, 1), jnp.float32, -bound, bound)
        params.append((w, b))
    return params


def reference_forward(x, params):
    """Pure-JAX reference with matching bf16-operand / f32-accumulation numerics."""
    h = x.T.astype(jnp.bfloat16)
    for i, (w, b) in enumerate(params):
        z = jnp.dot(w.astype(jnp.bfloat16), h,
                    preferred_element_type=jnp.float32) + b
        if i < len(params) - 1:
            h = jnp.maximum(z, 0.0).astype(jnp.bfloat16)
        else:
            h = jax.nn.sigmoid(z)
    return h.T                                            # (B, 1)


if __name__ == "__main__":
    key = jax.random.PRNGKey(0)
    n_features = 32

    k_in, k_params = jax.random.split(key)
    params = init_params(k_params, n_features)

    # Case 1: batch larger than the tile -> multi-step parallel grid + padding.
    x_big = jax.random.normal(k_in, (200, n_features), jnp.float32)
    out_big = jax.block_until_ready(net_forward(x_big, params, tb=128))
    ref_big = reference_forward(x_big, params)
    assert out_big.shape == (200, 1)
    assert jnp.allclose(out_big, ref_big, atol=2e-2, rtol=0.0)

    # Case 2: tiny batch -> single full-size tile path.
    x_small = x_big[:8]
    out_small = jax.block_until_ready(net_forward(x_small, params, tb=128))
    ref_small = reference_forward(x_small, params)
    assert out_small.shape == (8, 1)
    assert jnp.allclose(out_small, ref_small, atol=2e-2, rtol=0.0)

    print("KERNEL_OK")
</pallas_src>

<mosaic_0001>
module attributes {stable_mosaic.version = 11 : i64} {
  func.func @_mlp_kernel(%arg0: i32, %arg1: memref<32x128xbf16, #tpu.memory_space<vmem>>, %arg2: memref<128x32xbf16, #tpu.memory_space<vmem>>, %arg3: memref<128x1xf32, #tpu.memory_space<vmem>>, %arg4: memref<64x128xbf16, #tpu.memory_space<vmem>>, %arg5: memref<64x1xf32, #tpu.memory_space<vmem>>, %arg6: memref<16x64xbf16, #tpu.memory_space<vmem>>, %arg7: memref<16x1xf32, #tpu.memory_space<vmem>>, %arg8: memref<4x16xbf16, #tpu.memory_space<vmem>>, %arg9: memref<4x1xf32, #tpu.memory_space<vmem>>, %arg10: memref<1x4xbf16, #tpu.memory_space<vmem>>, %arg11: memref<1x1xf32, #tpu.memory_space<vmem>>, %arg12: memref<1x128xf32, #tpu.memory_space<vmem>>) attributes {dimension_semantics = [#tpu.dimension_semantics<parallel>], iteration_bounds = array<i64: 2>, scalar_prefetch = 0 : i64, scratch_operands = 0 : i64, tpu.core_type = #tpu.core_type<tc>, window_params = [{transform_indices = @transform_0, window_bounds = array<i64: 32, 128>}, {pipeline_mode = #tpu.pipeline_mode<synchronous>, transform_indices = @transform_1, window_bounds = array<i64: 128, 32>}, {pipeline_mode = #tpu.pipeline_mode<synchronous>, transform_indices = @transform_2, window_bounds = array<i64: 128, 1>}, {pipeline_mode = #tpu.pipeline_mode<synchronous>, transform_indices = @transform_3, window_bounds = array<i64: 64, 128>}, {pipeline_mode = #tpu.pipeline_mode<synchronous>, transform_indices = @transform_4, window_bounds = array<i64: 64, 1>}, {pipeline_mode = #tpu.pipeline_mode<synchronous>, transform_indices = @transform_5, window_bounds = array<i64: 16, 64>}, {pipeline_mode = #tpu.pipeline_mode<synchronous>, transform_indices = @transform_6, window_bounds = array<i64: 16, 1>}, {pipeline_mode = #tpu.pipeline_mode<synchronous>, transform_indices = @transform_7, window_bounds = array<i64: 4, 16>}, {pipeline_mode = #tpu.pipeline_mode<synchronous>, transform_indices = @transform_8, window_bounds = array<i64: 4, 1>}, {pipeline_mode = #tpu.pipeline_mode<synchronous>, transform_indices = @transform_9, window_bounds = array<i64: 1, 4>}, {pipeline_mode = #tpu.pipeline_mode<synchronous>, transform_indices = @transform_10, window_bounds = array<i64: 1, 1>}, {transform_indices = @transform_11, window_bounds = array<i64: 1, 128>}]} {
    %c0 = arith.constant 0 : index
    %c0_0 = arith.constant 0 : index
    %0 = vector.load %arg1[%c0, %c0_0] : memref<32x128xbf16, #tpu.memory_space<vmem>>, vector<32x128xbf16>
    %c0_1 = arith.constant 0 : index
    %c0_2 = arith.constant 0 : index
    %1 = vector.load %arg2[%c0_1, %c0_2] : memref<128x32xbf16, #tpu.memory_space<vmem>>, vector<128x32xbf16>
    %cst = arith.constant dense<0.000000e+00> : vector<128x128xf32>
    %2 = tpu.matmul %1, %0, %cst {dimension_numbers = #tpu.dot_dimension_numbers<[1], [0], [0], [1], [0, 0, 1, 1], [], []>} : vector<128x32xbf16>, vector<32x128xbf16>, vector<128x128xf32> -> vector<128x128xf32>
    %c0_3 = arith.constant 0 : index
    %c0_4 = arith.constant 0 : index
    %3 = vector.load %arg3[%c0_3, %c0_4] : memref<128x1xf32, #tpu.memory_space<vmem>>, vector<128x1xf32>
    %4 = vector.broadcast %3 : vector<128x1xf32> to vector<128x128xf32>
    %5 = arith.addf %2, %4 : vector<128x128xf32>
    %cst_5 = arith.constant 0.000000e+00 : f32
    %6 = vector.broadcast %cst_5 : f32 to vector<128x128xf32>
    %7 = arith.maximumf %5, %6 : vector<128x128xf32>
    %8 = arith.truncf %7 : vector<128x128xf32> to vector<128x128xbf16>
    %c0_6 = arith.constant 0 : index
    %c0_7 = arith.constant 0 : index
    %9 = vector.load %arg4[%c0_6, %c0_7] : memref<64x128xbf16, #tpu.memory_space<vmem>>, vector<64x128xbf16>
    %cst_8 = arith.constant dense<0.000000e+00> : vector<64x128xf32>
    %10 = tpu.matmul %9, %8, %cst_8 {dimension_numbers = #tpu.dot_dimension_numbers<[1], [0], [0], [1], [0, 0, 1, 1], [], []>} : vector<64x128xbf16>, vector<128x128xbf16>, vector<64x128xf32> -> vector<64x128xf32>
    %c0_9 = arith.constant 0 : index
    %c0_10 = arith.constant 0 : index
    %11 = vector.load %arg5[%c0_9, %c0_10] : memref<64x1xf32, #tpu.memory_space<vmem>>, vector<64x1xf32>
    %12 = vector.broadcast %11 : vector<64x1xf32> to vector<64x128xf32>
    %13 = arith.addf %10, %12 : vector<64x128xf32>
    %cst_11 = arith.constant 0.000000e+00 : f32
    %14 = vector.broadcast %cst_11 : f32 to vector<64x128xf32>
    %15 = arith.maximumf %13, %14 : vector<64x128xf32>
    %16 = arith.truncf %15 : vector<64x128xf32> to vector<64x128xbf16>
    %c0_12 = arith.constant 0 : index
    %c0_13 = arith.constant 0 : index
    %17 = vector.load %arg6[%c0_12, %c0_13] : memref<16x64xbf16, #tpu.memory_space<vmem>>, vector<16x64xbf16>
    %cst_14 = arith.constant dense<0.000000e+00> : vector<16x128xf32>
    %18 = tpu.matmul %17, %16, %cst_14 {dimension_numbers = #tpu.dot_dimension_numbers<[1], [0], [0], [1], [0, 0, 1, 1], [], []>} : vector<16x64xbf16>, vector<64x128xbf16>, vector<16x128xf32> -> vector<16x128xf32>
    %c0_15 = arith.constant 0 : index
    %c0_16 = arith.constant 0 : index
    %19 = vector.load %arg7[%c0_15, %c0_16] : memref<16x1xf32, #tpu.memory_space<vmem>>, vector<16x1xf32>
    %20 = vector.broadcast %19 : vector<16x1xf32> to vector<16x128xf32>
    %21 = arith.addf %18, %20 : vector<16x128xf32>
    %cst_17 = arith.constant 0.000000e+00 : f32
    %22 = vector.broadcast %cst_17 : f32 to vector<16x128xf32>
    %23 = arith.maximumf %21, %22 : vector<16x128xf32>
    %24 = arith.truncf %23 : vector<16x128xf32> to vector<16x128xbf16>
    %c0_18 = arith.constant 0 : index
    %c0_19 = arith.constant 0 : index
    %25 = vector.load %arg8[%c0_18, %c0_19] : memref<4x16xbf16, #tpu.memory_space<vmem>>, vector<4x16xbf16>
    %cst_20 = arith.constant dense<0.000000e+00> : vector<4x128xf32>
    %26 = tpu.matmul %25, %24, %cst_20 {dimension_numbers = #tpu.dot_dimension_numbers<[1], [0], [0], [1], [0, 0, 1, 1], [], []>} : vector<4x16xbf16>, vector<16x128xbf16>, vector<4x128xf32> -> vector<4x128xf32>
    %c0_21 = arith.constant 0 : index
    %c0_22 = arith.constant 0 : index
    %27 = vector.load %arg9[%c0_21, %c0_22] : memref<4x1xf32, #tpu.memory_space<vmem>>, vector<4x1xf32>
    %28 = vector.broadcast %27 : vector<4x1xf32> to vector<4x128xf32>
    %29 = arith.addf %26, %28 : vector<4x128xf32>
    %cst_23 = arith.constant 0.000000e+00 : f32
    %30 = vector.broadcast %cst_23 : f32 to vector<4x128xf32>
    %31 = arith.maximumf %29, %30 : vector<4x128xf32>
    %32 = arith.truncf %31 : vector<4x128xf32> to vector<4x128xbf16>
    %c0_24 = arith.constant 0 : index
    %c0_25 = arith.constant 0 : index
    %33 = vector.load %arg10[%c0_24, %c0_25] : memref<1x4xbf16, #tpu.memory_space<vmem>>, vector<1x4xbf16>
    %cst_26 = arith.constant dense<0.000000e+00> : vector<1x128xf32>
    %34 = tpu.matmul %33, %32, %cst_26 {dimension_numbers = #tpu.dot_dimension_numbers<[1], [0], [0], [1], [0, 0, 1, 1], [], []>} : vector<1x4xbf16>, vector<4x128xbf16>, vector<1x128xf32> -> vector<1x128xf32>
    %c0_27 = arith.constant 0 : index
    %c0_28 = arith.constant 0 : index
    %35 = vector.load %arg11[%c0_27, %c0_28] : memref<1x1xf32, #tpu.memory_space<vmem>>, vector<1x1xf32>
    %36 = vector.broadcast %35 : vector<1x1xf32> to vector<1x128xf32>
    %37 = arith.addf %34, %36 : vector<1x128xf32>
    %cst_29 = arith.constant 0.000000e+00 : f32
    %38 = vector.broadcast %cst_29 : f32 to vector<1x128xf32>
    %39 = arith.subf %38, %37 : vector<1x128xf32>
    %40 = math.exp %39 : vector<1x128xf32>
    %cst_30 = arith.constant 1.000000e+00 : f32
    %41 = vector.broadcast %cst_30 : f32 to vector<1x128xf32>
    %42 = arith.addf %41, %40 : vector<1x128xf32>
    %43 = tpu.reciprocal %42 {approx = true} : vector<1x128xf32> -> vector<1x128xf32>
    %c0_31 = arith.constant 0 : index
    %c0_32 = arith.constant 0 : index
    %44 = vector.load %arg12[%c0_31, %c0_32] : memref<1x128xf32, #tpu.memory_space<vmem>>, vector<1x128xf32>
    tpu.vector_store %arg12[%c0_31, %c0_32], %43 {strides = array<i32>} : memref<1x128xf32, #tpu.memory_space<vmem>>, vector<1x128xf32>,
    return
  }
  func.func @transform_0(%arg0: i32) -> (i32, i32) {
    %c0_i32 = arith.constant 0 : i32
    %c0_i32_0 = arith.constant 0 : i32
    return %c0_i32, %arg0 : i32, i32
  }
  func.func @transform_1(%arg0: i32) -> (i32, i32) {
    %c0_i32 = arith.constant 0 : i32
    %c0_i32_0 = arith.constant 0 : i32
    %c0_i32_1 = arith.constant 0 : i32
    return %c0_i32, %c0_i32_0 : i32, i32
  }
  func.func @transform_2(%arg0: i32) -> (i32, i32) {
    %c0_i32 = arith.constant 0 : i32
    %c0_i32_0 = arith.constant 0 : i32
    %c0_i32_1 = arith.constant 0 : i32
    return %c0_i32, %c0_i32_0 : i32, i32
  }
  func.func @transform_3(%arg0: i32) -> (i32, i32) {
    %c0_i32 = arith.constant 0 : i32
    %c0_i32_0 = arith.constant 0 : i32
    %c0_i32_1 = arith.constant 0 : i32
    return %c0_i32, %c0_i32_0 : i32, i32
  }
  func.func @transform_4(%arg0: i32) -> (i32, i32) {
    %c0_i32 = arith.constant 0 : i32
    %c0_i32_0 = arith.constant 0 : i32
    %c0_i32_1 = arith.constant 0 : i32
    return %c0_i32, %c0_i32_0 : i32, i32
  }
  func.func @transform_5(%arg0: i32) -> (i32, i32) {
    %c0_i32 = arith.constant 0 : i32
    %c0_i32_0 = arith.constant 0 : i32
    %c0_i32_1 = arith.constant 0 : i32
    return %c0_i32, %c0_i32_0 : i32, i32
  }
  func.func @transform_6(%arg0: i32) -> (i32, i32) {
    %c0_i32 = arith.constant 0 : i32
    %c0_i32_0 = arith.constant 0 : i32
    %c0_i32_1 = arith.constant 0 : i32
    return %c0_i32, %c0_i32_0 : i32, i32
  }
  func.func @transform_7(%arg0: i32) -> (i32, i32) {
    %c0_i32 = arith.constant 0 : i32
    %c0_i32_0 = arith.constant 0 : i32
    %c0_i32_1 = arith.constant 0 : i32
    return %c0_i32, %c0_i32_0 : i32, i32
  }
  func.func @transform_8(%arg0: i32) -> (i32, i32) {
    %c0_i32 = arith.constant 0 : i32
    %c0_i32_0 = arith.constant 0 : i32
    %c0_i32_1 = arith.constant 0 : i32
    return %c0_i32, %c0_i32_0 : i32, i32
  }
  func.func @transform_9(%arg0: i32) -> (i32, i32) {
    %c0_i32 = arith.constant 0 : i32
    %c0_i32_0 = arith.constant 0 : i32
    %c0_i32_1 = arith.constant 0 : i32
    return %c0_i32, %c0_i32_0 : i32, i32
  }
  func.func @transform_10(%arg0: i32) -> (i32, i32) {
    %c0_i32 = arith.constant 0 : i32
    %c0_i32_0 = arith.constant 0 : i32
    %c0_i32_1 = arith.constant 0 : i32
    return %c0_i32, %c0_i32_0 : i32, i32
  }
  func.func @transform_11(%arg0: i32) -> (i32, i32) {
    %c0_i32 = arith.constant 0 : i32
    %c0_i32_0 = arith.constant 0 : i32
    return %c0_i32, %arg0 : i32, i32
  }
}

</mosaic_0001>

<bundles_post_ra>
// kernel: tpu_custom_call.1
= control target key start
LH: loop header
LB: loop body
LE: loop exit
PB: predicated region body
PF: predicated region fallthrough
CT: control target
= control target key end

     0   :  { %s1746_s0 = inlined_call_operand.vmem [shape: bf16[32,256], index: 0, kind: input, shape index: {}]   ;;  %s1747_s1 = inlined_call_operand.vmem [shape: bf16[128,32], index: 1, kind: input, shape index: {}]   ;;  %s1748_s2 = inlined_call_operand.vmem [shape: f32[128,1], index: 2, kind: input, shape index: {}]   ;;  %s1749_s3 = inlined_call_operand.vmem [shape: bf16[64,128], index: 3, kind: input, shape index: {}]   ;;  %s1750_s4 = inlined_call_operand.vmem [shape: f32[64,1], index: 4, kind: input, shape index: {}]   ;;  %s1751_s5 = inlined_call_operand.vmem [shape: bf16[16,64], index: 5, kind: input, shape index: {}]   ;;  %s1752_s6 = inlined_call_operand.vmem [shape: f32[16,1], index: 6, kind: input, shape index: {}]   ;;  %s1753_s7 = inlined_call_operand.vmem [shape: bf16[4,16], index: 7, kind: input, shape index: {}]   ;;  %s1754_s8 = inlined_call_operand.vmem [shape: f32[4,1], index: 8, kind: input, shape index: {}]   ;;  %s1755_s9 = inlined_call_operand.vmem [shape: bf16[1,4], index: 9, kind: input, shape index: {}]   ;;  %s1756_s10 = inlined_call_operand.<no memory space> [shape: f32[1,1], index: 10, kind: input, shape index: {}]   ;;  %s1757_s11 = inlined_call_operand.hbm [shape: f32[1,256], index: 11, kind: output, shape index: {}]  }
   0x1   :  { %v16_v0 = vstv %s1756_s10 }
   0x2   :  { %17 = vst [vmem:[#allocation2] sm:$0x1] %v16_v0 }
   0x3   :  { %18 = vsyncpa [#allocation5], 0 }
   0x4   :  { %20 = vsyncpa [#allocation5 + $0x1], 0  ;;  %s1499_s19 = smov 0   ;;  %s1501_s20 = smov 0  }
   0x5   :  { %s1503_s21 = smov 0   ;;  %s1505_s22 = smov 0  }
   0x6 LB: > { %s1169_s10 = sadd.s32 4294967295, %s1430_s22   ;;  %s1170_s23 = sadd.s32 4294967294, %s1430_s22   ;;  %s1430_s22 = sphi %s1505_s22, %s1763_s22   ;;  %s1426_s21 = sphi %s1503_s21, %s1762_s21   ;;  %s1422_s20 = sphi %s1501_s20, %s1761_s20   ;;  %s1418_s19 = sphi %s1499_s19, %s1760_s19  }
   0x7   : > { %s1522_s24 = sadd.s32 1, %s1430_s22   ;;  %s33_s25 = sadd.s32 1, %s1426_s21 }
   0x8   : > { %s30_s26 = ssub.s32 %s1430_s22, %s1522_s24  ;;  %p40_p0 = scmp.ne.s32.totalorder %s1426_s21, %s1422_s20 }
   0x9   : > { %p31_p1 = scmp.eq.s32.totalorder %s30_s26, 0  ;;  %p41_p2 = scmp.eq.s32.totalorder %s1430_s22, 0 }
   0xa   : > { %p280_p3 = scmp.eq.s32.totalorder %s1169_s10, 1  ;;  %p285_p4 = scmp.ne.s32.totalorder %s1422_s20, %s1418_s19 }
   0xb   : > { %s1535_s27 = scalar_select %p31_p1, %s1426_s21, %s33_s25  }
   0xc   : > { %p42_p5 = por %p41_p2, %p40_p0  ;;  %p1537_p6 = por %p280_p3, %p40_p0 }
   0xd   : > { %p286_p7 = scmp.eq.s32.totalorder %s1170_s23, 1  ;;  %p1172_p9 = scmp.ge.s32.totalorder %s1430_s22, 2 }
   0xf   : > { %p1541_p8 = por %p286_p7, %p285_p4  ;;  %332 = sbr.rel (%p1172_p9) target bundleno = 29 (0x1d), region = 56 }
  0x16   : > { %335 = sbr.rel (!%p42_p5) target bundleno = 29 (0x1d), region = 60  ;;  %s337_s30 = sand.u32 (%p42_p5), 1, %s1426_s21  }
  0x17   : > { %s1174_s12 = sshll.u32 (%p42_p5), %s1430_s22, 2  ;;  %s1173_s13 = sshll.u32 (%p42_p5), %s337_s30, 4 }
  0x18   : > { %s341_s16 = scalar_lea.vmem (%p42_p5), %s1746_s0, %s1174_s12  ;;  %s339_s17 = scalar_lea.vmem (%p42_p5), [#allocation3], %s1173_s13 }
  0x19   : > { %v357_v1 = vld [vmem:[%s341_s16] sm:$0xf] (%p42_p5)  ;;  %v359_v2 = vld [vmem:[%s341_s16 + $0x8] sm:$0xf] (%p42_p5)  ;;  %v361_v3 = vld [vmem:[%s341_s16 + $0x10] sm:$0xf] (%p42_p5) }
  0x1a   : > { %358 = vst [vmem:[%s339_s17] sm:$0xf] (%p42_p5), %v357_v1  ;;  %360 = vst [vmem:[%s339_s17 + $0x4] sm:$0xf] (%p42_p5), %v359_v2  ;;  %v363_v4 = vld [vmem:[%s341_s16 + $0x18] sm:$0xf] (%p42_p5) }
  0x1b   : > { %362 = vst [vmem:[%s339_s17 + $0x8] sm:$0xf] (%p42_p5), %v361_v3  ;;  %364 = vst [vmem:[%s339_s17 + $0xc] sm:$0xf] (%p42_p5), %v363_v4 }
  0x1d PF: > { %p1175_p10 = scmp.ge.s32.totalorder %s1430_s22, 1  ;;  %p394_p11 = scmp.lt.s32.totalorder %s1430_s22, 3 }
  0x1f   : > { %p395_p12 = pnand %p1175_p10, %p394_p11 }
  0x20   : > { %s1556_s18 = sand.u32 (!%p395_p12), 1, %s1422_s20   ;;  %v1351_v5 = vld [vmem:[%s1747_s1] sm:$0xff] (!%p395_p12)   ;;  %vm608_vm0 = vcmask (!%p395_p12), 261120   ;;  %v1432_v8 = vmov (!%p395_p12), 0   ;;  %v1352_v9 = vld [vmem:[%s1747_s1 + $0x8] sm:$0xff] (!%p395_p12)   ;;  %v1353_v10 = vld [vmem:[%s1747_s1 + $0x10] sm:$0xff] (!%p395_p12)  }
  0x21   : > { %398 = sbr.rel (%p395_p12) target bundleno = 1234 (0x4d2), region = 101  ;;  %s1176_s26 = sshll.u32 (!%p395_p12), %s1556_s18, 4  ;;  %1241 = vmatprep.mubr.msk.bf16.mxu0 (!%p395_p12), %vm608_vm0, %v1351_v5  ;;  %1347 = vset.pattern.permute.xlu0 (!%p395_p12), %v1432_v8  ;;  %v460_v11 = vld [vmem:[%s1748_s2] sm:$0xff] (!%p395_p12)  ;;  %v462_v12 = vld [vmem:[%s1748_s2 + $0x10] sm:$0xff] (!%p395_p12)  ;;  %v461_v13 = vld [vmem:[%s1748_s2 + $0x8] sm:$0xff] (!%p395_p12)  ;;  %vm1434_vm1 = vmmov (!%p395_p12), 0  }
  0x22   : > { %s403_s30 = scalar_lea.vmem (!%p395_p12), [#allocation3], %s1176_s26  ;;  %1348 = vset.pattern.permute.xlu1 (!%p395_p12), %v1432_v8  ;;  %478 = vperm.xlu0 (!%p395_p12), %1347, %v460_v11   ;;  %v463_v14 = vld [vmem:[%s1748_s2 + $0x18] sm:$0xff] (!%p395_p12)  ;;  %v464_v15 = vld [vmem:[%s1748_s2 + $0x20] sm:$0xff] (!%p395_p12)  ;;  %v465_v16 = vld [vmem:[%s1748_s2 + $0x28] sm:$0xff] (!%p395_p12)  ;;  %vm930_vm2 = vcmask (!%p395_p12), 523264   ;;  %vm985_vm3 = vcmask (!%p395_p12), 130048  }
  0x23   : > { %v1349_v6 = vld [vmem:[%s403_s30] sm:$0xff] (!%p395_p12)   ;;  %v1350_v7 = vld [vmem:[%s403_s30 + $0x8] sm:$0xff] (!%p395_p12)   ;;  %488 = vperm.xlu1 (!%p395_p12), %1348, %v462_v12   ;;  %vm1046_vm4 = vcmask (!%p395_p12), 1041408   ;;  %vm1042_vm5 = vcmask (!%p395_p12), 31744   ;;  %s1203_s14 = sshll.u32 (!%p395_p12), %s1169_s10, 4  ;;  %s438_s15 = scalar_lea.vmem (!%p395_p12), [#allocation4], %s1556_s18 }
  0x24   : > { %1237 = vmatprep.subr.bf16.mxu0 (!%p395_p12), %v1349_v6  ;;  %v1354_v17 = vld [vmem:[%s1747_s1 + $0x18] sm:$0xff] (!%p395_p12)   ;;  %v1355_v18 = vld [vmem:[%s1747_s1 + $0x20] sm:$0xff] (!%p395_p12)   ;;  %v466_v19 = vld [vmem:[%s1748_s2 + $0x30] sm:$0xff] (!%p395_p12)  ;;  %s1109_s16 = sshll.u32 (!%p395_p12), %s438_s15, 4  ;;  %s1702_s25 = scalar_lea.hbm (!%p395_p12), %s1757_s11, %s1203_s14  ;;  %s1704_s16 = int_to_ptr.vmem [resolvable:$true] %s1109_s16 }
  0x25   : > { %1238 = vmatpush3.bf16.msra.mxu0 (!%p395_p12), %v1349_v6  ;;  %v467_v20 = vld [vmem:[%s1748_s2 + $0x38] sm:$0xff] (!%p395_p12)  ;;  %v468_v21 = vld [vmem:[%s1748_s2 + $0x40] sm:$0xff] (!%p395_p12)  ;;  %v469_v22 = vld [vmem:[%s1748_s2 + $0x48] sm:$0xff] (!%p395_p12)  ;;  %s1097_s26 = scalar_lea.sflag (!%p395_p12), [#allocation5], %s1556_s18  ;;  %s1368_s30 = scalar_lea.vmem (!%p395_p12), %s1704_s16, 16 }
  0x26   : > { %1239 = vmatprep.subr.bf16.mxu0 (!%p395_p12), %v1350_v7  ;;  %483 = vperm.xlu0 (!%p395_p12), %1347, %v461_v13   ;;  %v1356_v23 = vld [vmem:[%s1747_s1 + $0x28] sm:$0xff] (!%p395_p12)   ;;  %v1357_v24 = vld [vmem:[%s1747_s1 + $0x30] sm:$0xff] (!%p395_p12)   ;;  %v471_v26 = vld [vmem:[%s1748_s2 + $0x58] sm:$0xff] (!%p395_p12)  ;;  %p1369_p13 = scmp.ne.s32.totalorder (!%p395_p12), %s1704_s16, %s1368_s30  ;;  %s1435_s10 = smov (!%p395_p12), [#allocation4]  }
  0x27   : > { %493 = vperm.xlu1 (!%p395_p12), %1348, %v463_v14   ;;  %v470_v25 = vld [vmem:[%s1748_s2 + $0x50] sm:$0xff] (!%p395_p12)  ;;  %v472_v27 = vld [vmem:[%s1748_s2 + $0x60] sm:$0xff] (!%p395_p12)  ;;  %v473_v28 = vld [vmem:[%s1748_s2 + $0x68] sm:$0xff] (!%p395_p12)  ;;  %s1372_s12 = sshll.u32 (!%p395_p12), %s1435_s10, 4  ;;  %s1373_s12 = int_to_ptr.vmem [resolvable:$false] %s1372_s12 }
  0x28   : > { %v1358_v29 = vld [vmem:[%s1747_s1 + $0x38] sm:$0xff]   ;;  %v474_v30 = vld [vmem:[%s1748_s2 + $0x70] sm:$0xff]  ;;  %v762_v32 = vld [vmem:[%s1750_s4] sm:$0xff]  ;;  %p1370_p0 = pnand %p1369_p13, %p1537_p6  ;;  %s1374_s13 = scalar_lea.vmem %s1373_s12, 32 }
  0x29   : > { %1240 = vmatpush3.bf16.msra.mxu0 %v1350_v7  ;;  %v475_v31 = vld [vmem:[%s1748_s2 + $0x78] sm:$0xff]  ;;  %v763_v33 = vld [vmem:[%s1750_s4 + $0x8] sm:$0xff]  ;;  %v764_v34 = vld [vmem:[%s1750_s4 + $0x10] sm:$0xff]  ;;  %p1375_p2 = scmp.lt.s32.totalorder %s1704_s16, %s1373_s12  ;;  %p1376_p3 = scmp.lt.s32.totalorder %s1374_s13, %s1368_s30 }
  0x2a   : > { %498 = vperm.xlu0 %1347, %v464_v15   ;;  %v765_v35 = vld [vmem:[%s1750_s4 + $0x18] sm:$0xff]  ;;  %v766_v36 = vld [vmem:[%s1750_s4 + $0x20] sm:$0xff]  ;;  %v767_v37 = vld [vmem:[%s1750_s4 + $0x28] sm:$0xff]  ;;  %p1371_p1 = pneg %p1370_p0 }
  0x2b   : > { %503 = vperm.xlu1 %1348, %v465_v16   ;;  %v768_v38 = vld [vmem:[%s1750_s4 + $0x30] sm:$0xff]  ;;  %v769_v39 = vld [vmem:[%s1750_s4 + $0x38] sm:$0xff]  ;;  %v913_v40 = vld [vmem:[%s1752_s6] sm:$0xff]  ;;  %p1377_p4 = por %p1376_p3, %p1375_p2 }
  0x2c   : > { %1242 = vmatmul.mubr.msk.bf16.vlgmr.msra.gmra.mrb[0].mxu0 %vm608_vm0, %v1352_v9  ;;  %v914_v41 = vld [vmem:[%s1752_s6 + $0x8] sm:$0xff]  ;;  %v979_v42 = vld [vmem:[%s1754_s8] sm:$0xf] }
  0x2d   : > { %1245 = vmatprep.mubr.msk.bf16.mxu0 %vm608_vm0, %v1353_v10  ;;  %v1032_v43 = vld [vmem:[#allocation2] sm:$0x1]  ;;  %p1378_p5 = pnand %p1377_p4, %p1371_p1 }
  0x2e   : > { %508 = vperm.xlu0 %1347, %v466_v19   ;;  %v1359_v44 = vld [vmem:[%s1749_s3] sm:$0xff]  }
  0x2f   : > { %513 = vperm.xlu1 %1348, %v467_v20   ;;  %1273 = vmatprep.mubr.bf16.mxu1 %v1359_v44 }
  0x32   : > { %518 = vperm.xlu0 %1347, %v468_v21  }
  0x33   : > { %523 = vperm.xlu1 %1348, %v469_v22  }
  0x34   : > { %1246 = vmatmul.mubr.msk.bf16.gmra.mrb[4].mxu0 %vm608_vm0, %v1354_v17 }
  0x35   : > { %1249 = vmatprep.mubr.msk.bf16.mxu0 %vm608_vm0, %v1355_v18 }
  0x36   : > { %528 = vperm.xlu0 %1347, %v470_v25  }
  0x37   : > { %533 = vperm.xlu1 %1348, %v471_v26  }
  0x3a   : > { %538 = vperm.xlu0 %1347, %v472_v27  }
  0x3b   : > { %543 = vperm.xlu1 %1348, %v473_v28  }
  0x3c   : > { %1250 = vmatmul.mubr.msk.bf16.gmra.mrb[8].mxu0 %vm608_vm0, %v1356_v23 }
  0x3d   : > { %1253 = vmatprep.mubr.msk.bf16.mxu0 %vm608_vm0, %v1357_v24 }
  0x3e   : > { %548 = vperm.xlu0 %1347, %v474_v30  }
  0x3f   : > { %553 = vperm.xlu1 %1348, %v475_v31  }
  0x42   : > { %772 = vperm.xlu0 %1347, %v762_v32  }
  0x43   : > { %777 = vperm.xlu1 %1348, %v763_v33  }
  0x44   : > { %1254 = vmatmul.mubr.msk.bf16.gmra.mrb[12].mxu0 %vm608_vm0, %v1358_v29 }
  0x46   : > { %782 = vperm.xlu0 %1347, %v764_v34  }
  0x47   : > { %787 = vperm.xlu1 %1348, %v765_v35  }
  0x4a   : > { %792 = vperm.xlu0 %1347, %v766_v36  }
  0x4b   : > { %797 = vperm.xlu1 %1348, %v767_v37  }
  0x4e   : > { %802 = vperm.xlu0 %1347, %v768_v38  }
  0x4f   : > { %807 = vperm.xlu1 %1348, %v769_v39  }
  0x52   : > { %917 = vperm.xlu0 %1347, %v913_v40  }
  0x53   : > { %922 = vperm.xlu1 %1348, %v914_v41  }
  0x56   : > { %982 = vperm.xlu0 %1347, %v979_v42  }
  0x57   : > { %1035 = vperm.xlu1 %1348, %v1032_v43  }
  0xa1   : > { %v479_v45 = vpop.permute.xlu0 %478 }
  0xa2   : > { %v489_v46 = vpop.permute.xlu1 %488 }
  0xa5   : > { %v484_v47 = vpop.permute.xlu0 %483 }
  0xa6   : > { %v494_v48 = vpop.permute.xlu1 %493 }
  0xa9   : > { %v499_v49 = vpop.permute.xlu0 %498 }
  0xaa   : > { %v504_v50 = vpop.permute.xlu1 %503 }
  0xad   : > { %v509_v51 = vpop.permute.xlu0 %508 }
  0xae   : > { %v514_v55 = vpop.permute.xlu1 %513 }
  0xb1   : > { %v519_v63 = vpop.permute.xlu0 %518 }
  0xb2   : > { %v524_v3 = vpop.permute.xlu1 %523 }
  0xb5   : > { %v529_v12 = vpop.permute.xlu0 %528 }
  0xb6   : > { %v534_v16 = vpop.permute.xlu1 %533 }
  0xb9   : > { %v539_v24 = vpop.permute.xlu0 %538 }
  0xba   : > { %v544_v29 = vpop.permute.xlu1 %543 }
  0xbd   : > { %v549_v36 = vpop.permute.xlu0 %548 }
  0xbe   : > { %v554_v41 = vpop.permute.xlu1 %553 }
  0xff   : > { %v1243_v52 = vpop.f32.mrb[0].mxu0 }
 0x100   : > { %v676_v53 = vadd.f32 %v1243_v52, %v489_v46  ;;  %v667_v54 = vpop.f32.mrb[1].mxu0 }
 0x101   : > { %v668_v56 = vadd.f32 %v667_v54, %v479_v45  ;;  %v1244_v57 = vpop.f32.mrb[2].mxu0  ;;  %v1361_v54 = vld [vmem:[%s1749_s3 + $0x10] sm:$0xff]  }
 0x102   : > { %v679_v58 = vadd.f32 %v1244_v57, %v494_v48  ;;  %v670_v59 = vpop.f32.mrb[3].mxu0  ;;  %v732_v61 = vmax.f32 %v676_v53, 0.0  ;;  %v1360_v53 = vld [vmem:[%s1749_s3 + $0x8] sm:$0xff]   ;;  %v773_v57 = vpop.permute.xlu0 %772 }
 0x103   : > { %v671_v60 = vadd.f32 %v670_v59, %v484_v47  ;;  %v730_v0 = vmax.f32 %v668_v56, 0.0  ;;  %v1433_v56 = vmov 0.0  }
 0x104   : > { %v733_v62 = vmax.f32 %v679_v58, 0.0  ;;  %1281 = vmatprep.subr.bf16.mxu0 %v1433_v56  ;;  %1289 = vmatprep.mubr.msk.bf16.mxu0 %vm1434_vm1, %v1433_v56  ;;  %v778_v58 = vpop.permute.xlu1 %777 }
 0x105   : > { %v731_v1 = vmax.f32 %v671_v60, 0.0 }
 0x106   : > { %v747_v2 = vpack.c.bf16 %v733_v62, %v732_v61  ;;  %v783_v59 = vpop.permute.xlu0 %782 }
 0x107   : > { %v1247_v4 = vpop.f32.mrb[4].mxu0  ;;  %v746_v5 = vpack.c.bf16 %v731_v1, %v730_v0 }
 0x108   : > { %v692_v6 = vadd.f32 %v1247_v4, %v509_v51  ;;  %v683_v7 = vpop.f32.mrb[5].mxu0  ;;  %v788_v60 = vpop.permute.xlu1 %787 }
 0x109   : > { %v684_v8 = vadd.f32 %v683_v7, %v499_v49  ;;  %v1248_v9 = vpop.f32.mrb[6].mxu0  ;;  %1257 = vmatprep.subr.bf16.mxu1 %v746_v5 }
 0x10a   : > { %v695_v10 = vadd.f32 %v1248_v9, %v514_v55  ;;  %v686_v11 = vpop.f32.mrb[7].mxu0  ;;  %1258 = vmatpush3.bf16.msra.mxu1 %v746_v5  ;;  %v736_v14 = vmax.f32 %v692_v6, 0.0  ;;  %v1362_v55 = vld [vmem:[%s1749_s3 + $0x18] sm:$0xff]   ;;  %v793_v0 = vpop.permute.xlu0 %792 }
 0x10b   : > { %v687_v13 = vadd.f32 %v686_v11, %v504_v50  ;;  %1259 = vmatprep.subr.bf16.mxu1 %v747_v2  ;;  %v734_v17 = vmax.f32 %v684_v8, 0.0 }
 0x10c   : > { %v737_v15 = vmax.f32 %v695_v10, 0.0  ;;  %v798_v5 = vpop.permute.xlu1 %797 }
 0x10d   : > { %v735_v18 = vmax.f32 %v687_v13, 0.0 }
 0x10e   : > { %v749_v19 = vpack.c.bf16 %v737_v15, %v736_v14  ;;  %1260 = vmatpush3.bf16.msra.mxu1 %v747_v2 }
 0x10f   : > { %v748_v20 = vpack.c.bf16 %v735_v18, %v734_v17  ;;  %v1251_v21 = vpop.f32.mrb[8].mxu0 }
 0x110   : > { %v708_v22 = vadd.f32 %v1251_v21, %v529_v12  ;;  %v699_v23 = vpop.f32.mrb[9].mxu0  ;;  %v803_v12 = vpop.permute.xlu0 %802 }
 0x111   : > { %v700_v25 = vadd.f32 %v699_v23, %v519_v63  ;;  %v1252_v26 = vpop.f32.mrb[10].mxu0  ;;  %1261 = vmatprep.subr.bf16.mxu1 %v748_v20  ;;  %v808_v17 = vpop.permute.xlu1 %807 }
 0x112   : > { %v711_v27 = vadd.f32 %v1252_v26, %v534_v16  ;;  %v702_v28 = vpop.f32.mrb[11].mxu0  ;;  %1262 = vmatpush3.bf16.msra.mxu1 %v748_v20  ;;  %v740_v31 = vmax.f32 %v708_v22, 0.0 }
 0x113   : > { %v703_v30 = vadd.f32 %v702_v28, %v524_v3  ;;  %1263 = vmatprep.subr.bf16.mxu1 %v749_v19  ;;  %v738_v33 = vmax.f32 %v700_v25, 0.0 }
 0x114   : > { %v741_v32 = vmax.f32 %v711_v27, 0.0 }
 0x115   : > { %v739_v34 = vmax.f32 %v703_v30, 0.0  ;;  %v918_v30 = vpop.permute.xlu0 %917 }
 0x116   : > { %v751_v35 = vpack.c.bf16 %v741_v32, %v740_v31  ;;  %1264 = vmatpush3.bf16.msra.mxu1 %v749_v19 }
 0x117   : > { %v750_v37 = vpack.c.bf16 %v739_v34, %v738_v33  ;;  %v1255_v38 = vpop.f32.mrb[12].mxu0  ;;  %v923_v34 = vpop.permute.xlu1 %922 }
 0x118   : > { %v724_v39 = vadd.f32 %v1255_v38, %v549_v36  ;;  %v715_v40 = vpop.f32.mrb[13].mxu0 }
 0x119   : > { %v716_v42 = vadd.f32 %v715_v40, %v539_v24  ;;  %v1256_v43 = vpop.f32.mrb[14].mxu0  ;;  %1265 = vmatprep.subr.bf16.mxu1 %v750_v37 }
 0x11a   : > { %v727_v44 = vadd.f32 %v1256_v43, %v554_v41  ;;  %v718_v45 = vpop.f32.mrb[15].mxu0  ;;  %1266 = vmatpush3.bf16.msra.mxu1 %v750_v37  ;;  %v744_v47 = vmax.f32 %v724_v39, 0.0  ;;  %v978_v41 = vld [vmem:[%s1753_s7] sm:$0x3] }
 0x11b   : > { %v719_v46 = vadd.f32 %v718_v45, %v544_v29  ;;  %1267 = vmatprep.subr.bf16.mxu1 %v751_v35  ;;  %v742_v49 = vmax.f32 %v716_v42, 0.0  ;;  %v1363_v29 = vld [vmem:[%s1751_s5] sm:$0xff]   ;;  %v983_v42 = vpop.permute.xlu0 %982 }
 0x11c   : > { %v745_v48 = vmax.f32 %v727_v44, 0.0 }
 0x11d   : > { %v743_v50 = vmax.f32 %v719_v46, 0.0 }
 0x11e   : > { %v753_v51 = vpack.c.bf16 %v745_v48, %v744_v47  ;;  %1268 = vmatpush3.bf16.msra.mxu1 %v751_v35 }
 0x11f   : > { %v752_v52 = vpack.c.bf16 %v743_v50, %v742_v49 }
 0x121   : > { %1269 = vmatprep.subr.bf16.mxu1 %v752_v52 }
 0x122   : > { %1270 = vmatpush3.bf16.msra.mxu1 %v752_v52  ;;  %v1038_v52 = vlaneseq }
 0x123   : > { %1271 = vmatprep.subr.bf16.mxu1 %v753_v51 }
 0x126   : > { %1272 = vmatpush3.bf16.msra.mxu1 %v753_v51  ;;  %v1031_v51 = vld [vmem:[%s1755_s9] sm:$0x1] }
 0x127   : > { %1299 = vmatprep.subr.bf16.mxu1 %v1433_v56 }
 0x129   : > { %1274 = vmatmul.mubr.bf16.vlgmr.msra.gmra.mrb[0].mxu1 %v1360_v53  ;;  %v1039_v53 = vshrl.u32 %v1038_v52, 7 }
 0x12a   : > { %1277 = vmatprep.mubr.bf16.mxu1 %v1361_v54 }
 0x12b   : > { %v1040_v54 = vsub.s32 0, %v1039_v53 }
 0x131   : > { %1278 = vmatmul.mubr.bf16.gmra.mrb[4].mxu1 %v1362_v55  ;;  %v1036_v55 = vpop.permute.xlu1 %1035 }
 0x132   : > { %1301 = vmatprep.mubr.msk.bf16.mxu1 %vm1434_vm1, %v1433_v56 }
 0x1fc   : > { %v1275_v61 = vpop.f32.mrb[0].mxu1 }
 0x1fd   : > { %v877_v62 = vadd.f32 %v1275_v61, %v783_v59  ;;  %v868_v63 = vpop.f32.mrb[1].mxu1 }
 0x1fe   : > { %v869_v1 = vadd.f32 %v868_v63, %v773_v57  ;;  %v1276_v2 = vpop.f32.mrb[2].mxu1 }
 0x1ff   : > { %v880_v3 = vadd.f32 %v1276_v2, %v788_v60  ;;  %v871_v4 = vpop.f32.mrb[3].mxu1  ;;  %v901_v7 = vmax.f32 %v877_v62, 0.0 }
 0x200   : > { %v872_v6 = vadd.f32 %v871_v4, %v778_v58  ;;  %v899_v9 = vmax.f32 %v869_v1, 0.0 }
 0x201   : > { %v902_v8 = vmax.f32 %v880_v3, 0.0 }
 0x202   : > { %v900_v10 = vmax.f32 %v872_v6, 0.0 }
 0x203   : > { %v908_v11 = vpack.c.bf16 %v902_v8, %v901_v7 }
 0x204   : > { %v907_v13 = vpack.c.bf16 %v900_v10, %v899_v9  ;;  %v1279_v14 = vpop.f32.mrb[4].mxu1 }
 0x205   : > { %v893_v15 = vadd.f32 %v1279_v14, %v803_v12  ;;  %v884_v16 = vpop.f32.mrb[5].mxu1 }
 0x206   : > { %v885_v18 = vadd.f32 %v884_v16, %v793_v0  ;;  %v1280_v19 = vpop.f32.mrb[6].mxu1  ;;  %1282 = vmatpush3.bf16.msra.mxu0 %v907_v13 }
 0x207   : > { %v896_v20 = vadd.f32 %v1280_v19, %v808_v17  ;;  %v887_v21 = vpop.f32.mrb[7].mxu1  ;;  %1283 = vmatprep.subr.bf16.mxu0 %v1433_v56  ;;  %v905_v23 = vmax.f32 %v893_v15, 0.0 }
 0x208   : > { %v888_v22 = vadd.f32 %v887_v21, %v798_v5  ;;  %v903_v25 = vmax.f32 %v885_v18, 0.0 }
 0x209   : > { %v906_v24 = vmax.f32 %v896_v20, 0.0 }
 0x20a   : > { %v904_v26 = vmax.f32 %v888_v22, 0.0  ;;  %1284 = vmatpush3.bf16.msra.mxu0 %v908_v11 }
 0x20b   : > { %v910_v27 = vpack.c.bf16 %v906_v24, %v905_v23  ;;  %1285 = vmatprep.subr.bf16.mxu0 %v1433_v56 }
 0x20c   : > { %v909_v28 = vpack.c.bf16 %v904_v26, %v903_v25 }
 0x20e   : > { %1286 = vmatpush3.bf16.msra.mxu0 %v909_v28 }
 0x20f   : > { %1287 = vmatprep.subr.bf16.mxu0 %v1433_v56 }
 0x212   : > { %1288 = vmatpush3.bf16.msra.mxu0 %v910_v27 }
 0x213   : > { %1293 = vmatprep.subr.bf16.mxu0 %v1433_v56 }
 0x215   : > { %1290 = vmatmul.mubr.msk.bf16.vlgmr.msra.gmra.mrb[16].mxu0 %vm930_vm2, %v1363_v29 }
 0x216   : > { %1295 = vmatprep.mubr.msk.bf16.mxu0 %vm1434_vm1, %v1433_v56  ;;  %v1041_v56 = vrot.slane %v1036_v55, %v1040_v54 }
 0x2e8   : > { %v968_v31 = vpop.f32.mrb[16].mxu0 }
 0x2e9   : > { %v969_v32 = vadd.f32 %v968_v31, %v918_v30  ;;  %v1291_v33 = vpop.f32.mrb[17].mxu0 }
 0x2ea   : > { %v971_v35 = vpop.f32.mrb[18].mxu0 }
 0x2eb   : > { %v972_v36 = vadd.f32 %v971_v35, %v923_v34  ;;  %v1292_v37 = vpop.f32.mrb[19].mxu0  ;;  %v975_v38 = vmax.f32 %v969_v32, 0.0 }
 0x2ed   : > { %v976_v39 = vmax.f32 %v972_v36, 0.0 }
 0x2ef   : > { %v977_v40 = vpack.c.bf16 %v976_v39, %v975_v38 }
 0x2f1   : > { %1294 = vmatpush3.bf16.msra.mxu0 %v977_v40 }
 0x2f4   : > { %1296 = vmatmul.mubr.msk.bf16.vlgmr.msra.gmra.mrb[20].mxu0 %vm985_vm3, %v978_v41 }
 0x3c7   : > { %v1023_v43 = vpop.f32.mrb[20].mxu0 }
 0x3c8   : > { %v1024_v44 = vadd.f32 %v1023_v43, %v983_v42  ;;  %v1297_v45 = vpop.f32.mrb[21].mxu0 }
 0x3c9   : > { %v1026_v46 = vpop.f32.mrb[22].mxu0 }
 0x3ca   : > { %v1029_v47 = vmax.f32 %v1024_v44, 0.0  ;;  %v1298_v48 = vpop.f32.mrb[23].mxu0 }
 0x3cc   : > { %v1030_v49 = vpack.c.bf16 %v1029_v47, %v1029_v47 }
 0x3ce   : > { %v1048_v50 = vsel %vm1046_vm4, %v1030_v49, 0 }
 0x3cf   : > { %1300 = vmatpush3.bf16.msra.mxu1 %v1048_v50 }
 0x3d2   : > { %1302 = vmatmul.mubr.msk.bf16.vlgmr.msra.gmra.mrb[8].mxu1 %vm1042_vm5, %v1031_v51 }
 0x4a5   : > { %v1084_v57 = vpop.f32.mrb[8].mxu1 }
 0x4a6   : > { %v1085_v58 = vadd.f32 %v1084_v57, %v1041_v56  ;;  %v1303_v59 = vpop.f32.mrb[9].mxu1 }
 0x4a7   : > { %v1087_v60 = vpop.f32.mrb[10].mxu1 }
 0x4a8   : > { %v1090_v61 = vsub.f32 0.0, %v1085_v58  ;;  %v1304_v62 = vpop.f32.mrb[11].mxu1 }
 0x4aa   : > { %v1091_v63 = vmul.f32 1.442695, %v1090_v61 }
 0x4ac   : > { %1364 = vpow2.f32 %v1091_v63 }
 0x4b6   : > { %v1365_v0 = vpop.eup %1364 }
 0x4b7   : > { %v1093_v1 = vadd.f32 1.0, %v1365_v0 }
 0x4b9   : > { %1366 = vrcp.f32 %v1093_v1 }
 0x4c3   : > { %v1367_v2 = vpop.eup %1366 }
 0x4c4   : > { %1095 = vst [vmem:[%s438_s15] sm:$0x1] %v1367_v2 }
 0x4c5   : > { %1381 = shalt.err (!%p1378_p5)
}
 0x4c6   : > { %s1382_s18 = scalar_lea.hbm %s1702_s25, 16  ;;  %s1386_s17 = scalar_lea.hbm %s1757_s11, 32 }
 0x4c7   : > { %p1383_p7 = scmp.ne.s32.totalorder %s1702_s25, %s1382_s18  ;;  %p1387_p12 = scmp.lt.u32.totalorder %s1702_s25, %s1757_s11 }
 0x4c8   : > { %p1388_p13 = scmp.lt.u32.totalorder %s1386_s17, %s1382_s18  ;;  %p1390_p1 = scmp.lt.u32.totalorder %s1382_s18, %s1702_s25 }
 0x4c9   : > { %p1384_p10 = pnand %p1383_p7, %p1537_p6 }
 0x4ca   : > { %p1389_p0 = por %p1388_p13, %p1387_p12 }
 0x4cb   : > { %p1385_p11 = pneg %p1384_p10 }
 0x4cc   : > { %p1391_p2 = por %p1390_p1, %p1389_p0 }
 0x4ce   : > { %p1392_p3 = pnand %p1391_p2, %p1385_p11 }
 0x4d0   : > { %1395 = shalt.err (!%p1392_p3)
}
 0x4d1   : > { %1305 = dma.vmem_to_hbm [thread:$0]  (%p1537_p6), %s1704_s16, 16, %s1702_s25, %s1097_s26  }
 0x4d2 PF: > { %s1121_s30 = sand.u32 1, %s1418_s19   ;;  %p1308_p4 = pnand %p1172_p9, %p1541_p8 }
 0x4d3   : > { %s1122_s12 = scalar_lea.sflag [#allocation5], %s1121_s30 }
 0x4d4   : > { %1413 = dma.done.wait (!%p1308_p4), %s1122_s12, 16  }
 0x4d5   : > { %1415 = vsyncadd (!%p1308_p4), %s1122_s12, 4294967280  ;;  %p23_p5 = scmp.ge.s32.totalorder %s1522_s24, 4   ;;  %s1760_s19 = smov %s1422_s20 }
 0x4d6   : > { %s1761_s20 = smov %s1426_s21  ;;  %s1762_s21 = smov %s1535_s27 }
 0x4d7   : > { %s1763_s22 = smov %s1522_s24  ;;  %25 = sbr.rel (!%p23_p5) target bundleno = 6 (0x6), region = 145 }
 0x4de   :  { %1126 = vsyncpa [#allocation5], 1 }
 0x4df   :  { %1128 = vsyncpa [#allocation5 + $0x1], 1 }

</bundles_post_ra>
